<compile_context>
chip_gen: v7x
topology: tpu7x:2x2x1
jax: 0.10.0
libtpu: 0.0.40
codegen_flags: <defaults>
</compile_context>

<pallas_src>
import functools

import jax
import jax.numpy as jnp
from jax import lax
from jax.experimental import pallas as pl
from jax.experimental.pallas import tpu as pltpu


MASK_FILL = -1000000000000.0   # Python float literal -> no captured array const
LANE = 128


# ----------------------------------------------------------------------------
# Planning helpers.
# ----------------------------------------------------------------------------
def _vmem_capacity_bytes():
    try:
        return int(pltpu.get_tpu_info().vmem_capacity_bytes)
    except Exception:
        return 64 << 20   # conservative (v7x-sized) default


def _pad_last_to(x, multiple):
    pad = (-x.shape[-1]) % multiple
    if pad == 0:
        return x
    widths = [(0, 0)] * (x.ndim - 1) + [(0, pad)]
    return jnp.pad(x, widths)


def _pick_q_tile(Q, max_tile=512):
    """Full Q when small; otherwise prefer 256-/128-aligned divisors of Q."""
    if Q <= max_tile:
        return Q
    for align in (256, 128, 8):
        t = max_tile - (max_tile % align)
        while t > 0:
            if Q % t == 0:
                return t
            t -= align
    return Q


def _pick_batch_block(B, per_batch_bytes, budget_bytes):
    bb = max(1, min(B, budget_bytes // max(per_batch_bytes, 1)))
    if B >= 2:
        # Keep >= 2 steps on the parallel batch axis so v7x's 2 TCs both work.
        bb = min(bb, max(1, B // 2))
    while B % bb:
        bb -= 1
    return bb


def _common_plan(B, Q, L, Hp, in_itemsize, c_itemsize, mask_itemsize,
                 max_q_tile):
    vmem_cap = _vmem_capacity_bytes()
    tq = _pick_q_tile(Q, max_q_tile)
    per_batch = (
        2 * (2 * tq * Hp + L * Hp) * in_itemsize      # double-buffered I/O
        + 2 * tq * L * mask_itemsize                  # double-buffered mask
        + (L * Hp + tq * Hp + tq * L) * c_itemsize    # in-kernel bf16 copies
        + (2 * tq * L + tq * Hp) * 4)                 # f32 intermediates
    budget = max(6 << 20, vmem_cap // 8)              # ~16 MiB @128, ~8 MiB @64
    bb = _pick_batch_block(B, per_batch, budget)
    vmem_est = bb * per_batch + B * 4
    cp_kwargs = dict(dimension_semantics=("parallel", "arbitrary"))
    if vmem_est > (12 << 20):
        safe_cap = min(vmem_cap * 3 // 4, 96 << 20)   # never exceed physical
        cp_kwargs["vmem_limit_bytes"] = int(
            min(max(vmem_est * 3 // 2, 16 << 20), safe_cap))
    return tq, bb, cp_kwargs


# ----------------------------------------------------------------------------
# Shared masked-softmax attention core (runs inside the kernels).
# ----------------------------------------------------------------------------
def _attend(h, o, mask_scores_fn, *, compute_dtype, exact_recip):
    # h: (bb, tq, Hp), o: (bb, L, Hp)  -- both already in compute_dtype.
    # scores[b,q,l] = sum_h h[b,q,h] * o[b,l,h]; no explicit transpose.
    scores = lax.dot_general(
        h, o, dimension_numbers=(((2,), (2,)), ((0,), (0,))),
        preferred_element_type=jnp.float32)            # (bb, tq, L) f32
    scores = mask_scores_fn(scores)

    mx = jnp.max(scores, axis=-1, keepdims=True)
    e = jnp.exp(scores - mx)
    denom = jnp.sum(e, axis=-1, keepdims=True)          # (bb, tq, 1) f32

    # Normalization folded after the second matmul (probabilities cast back
    # to the MXU compute dtype; accumulation in f32).
    ctx = lax.dot_general(
        e.astype(compute_dtype), o,
        dimension_numbers=(((2,), (1,)), ((0,), (0,))),
        preferred_element_type=jnp.float32)              # (bb, tq, Hp) f32
    if exact_recip:
        return ctx / denom
    return ctx * pl.reciprocal(denom, approx=True)


# ----------------------------------------------------------------------------
# Fast path: padding mask built in-kernel from per-batch lengths.
# ----------------------------------------------------------------------------
def _attn_slot_lengths_kernel(len_ref, h_ref, o_ref, ctx_ref, *scratch,
                              bb, compute_dtype, exact_recip):
    # len_ref: (B, 1) int32 (full array in VMEM)
    # h_ref:   (bb, tq, Hp)   o_ref: (bb, L, Hp)   ctx_ref: (bb, tq, Hp)
    # scratch: optional (bb, L, Hp) compute_dtype cache for the cast outputs.
    if scratch:
        o_cast_ref, = scratch

        @pl.when(pl.program_id(1) == 0)   # outputs block is resident across q
        def _():
            o_cast_ref[...] = o_ref[...].astype(compute_dtype)

        o = o_cast_ref[...]
    else:
        o = o_ref[...].astype(compute_dtype)

    b0 = pl.multiple_of(pl.program_id(0) * bb, bb)
    lens = len_ref[pl.ds(b0, bb), :]                     # (bb, 1) int32
    h = h_ref[...].astype(compute_dtype)

    def mask_scores(scores):
        # position l is masked iff l >= length[b]
        pos = lax.broadcasted_iota(jnp.int32, scores.shape, 2)
        return jnp.where(pos >= lens[:, :, None], MASK_FILL, scores)

    ctx = _attend(h, o, mask_scores, compute_dtype=compute_dtype,
                  exact_recip=exact_recip)
    ctx_ref[...] = ctx.astype(ctx_ref.dtype)


def attn_slot_from_lengths(hidden, outputs, lengths, *,
                           compute_dtype=jnp.bfloat16, max_q_tile=512):
    """hidden: (B, Q, H), outputs: (B, L, H), lengths: (B,) int — position l of
    batch b is attended iff l < lengths[b] (mask[b, :, l] = l >= lengths[b])."""
    B, Q, H = hidden.shape
    _, L, _ = outputs.shape
    compute_dtype = jnp.dtype(compute_dtype)
    exact_recip = compute_dtype == jnp.float32

    # Lane-dense H: zero-pad to a multiple of 128 so both matmuls and the ctx
    # store use full vregs / unmasked stores; padding contributes exact zeros.
    h_in = _pad_last_to(hidden, LANE)
    o_in = _pad_last_to(outputs, LANE)
    Hp = h_in.shape[-1]

    len_in = lengths.astype(jnp.int32).reshape(B, 1)

    in_isize = jnp.dtype(hidden.dtype).itemsize
    tq, bb, cp_kwargs = _common_plan(B, Q, L, Hp, in_isize,
                                     compute_dtype.itemsize, 0, max_q_tile)
    n_q = Q // tq

    use_cast_scratch = (n_q > 1) and (compute_dtype != jnp.dtype(hidden.dtype))
    scratch_shapes = ([pltpu.VMEM((bb, L, Hp), compute_dtype)]
                      if use_cast_scratch else [])

    kernel = functools.partial(_attn_slot_lengths_kernel, bb=bb,
                               compute_dtype=compute_dtype,
                               exact_recip=exact_recip)

    ctx = pl.pallas_call(
        kernel,
        out_shape=jax.ShapeDtypeStruct((B, Q, Hp), hidden.dtype),
        grid_spec=pltpu.PrefetchScalarGridSpec(
            num_scalar_prefetch=0,
            grid=(B // bb, n_q),
            in_specs=[
                pl.BlockSpec((B, 1), lambda b, q: (0, 0)),           # lengths
                pl.BlockSpec((bb, tq, Hp), lambda b, q: (b, q, 0)),  # hidden
                pl.BlockSpec((bb, L, Hp), lambda b, q: (b, 0, 0)),   # outputs
            ],
            out_specs=pl.BlockSpec((bb, tq, Hp), lambda b, q: (b, q, 0)),
            scratch_shapes=scratch_shapes,
        ),
        compiler_params=pltpu.CompilerParams(**cp_kwargs),
    )(len_in, h_in, o_in)
    return ctx[..., :H] if Hp != H else ctx


# ----------------------------------------------------------------------------
# General path: arbitrary boolean mask (exact PyTorch signature).
# ----------------------------------------------------------------------------
def _attn_slot_mask_kernel(h_ref, o_ref, m_ref, ctx_ref, *scratch,
                           compute_dtype, exact_recip):
    if scratch:
        o_cast_ref, = scratch

        @pl.when(pl.program_id(1) == 0)
        def _():
            o_cast_ref[...] = o_ref[...].astype(compute_dtype)

        o = o_cast_ref[...]
    else:
        o = o_ref[...].astype(compute_dtype)

    h = h_ref[...].astype(compute_dtype)                 # (bb, tq, Hp)
    m = m_ref[...]                                       # (bb, tq, L) int8

    def mask_scores(scores):
        return jnp.where(m != 0, MASK_FILL, scores)

    ctx = _attend(h, o, mask_scores, compute_dtype=compute_dtype,
                  exact_recip=exact_recip)
    ctx_ref[...] = ctx.astype(ctx_ref.dtype)


def attn_slot(hidden, outputs, mask, *, compute_dtype=jnp.bfloat16,
              max_q_tile=512):
    """hidden: (B, Q, H), outputs: (B, L, H), mask: (B, Q, L) bool (True = masked)."""
    B, Q, H = hidden.shape
    _, L, _ = outputs.shape
    compute_dtype = jnp.dtype(compute_dtype)
    exact_recip = compute_dtype == jnp.float32

    h_in = _pad_last_to(hidden, LANE)
    o_in = _pad_last_to(outputs, LANE)
    Hp = h_in.shape[-1]
    mask_i8 = mask.astype(jnp.int8)     # 4x less HBM traffic than int32

    in_isize = jnp.dtype(hidden.dtype).itemsize
    tq, bb, cp_kwargs = _common_plan(B, Q, L, Hp, in_isize,
                                     compute_dtype.itemsize, 1, max_q_tile)
    n_q = Q // tq

    use_cast_scratch = (n_q > 1) and (compute_dtype != jnp.dtype(hidden.dtype))
    scratch_shapes = ([pltpu.VMEM((bb, L, Hp), compute_dtype)]
                      if use_cast_scratch else [])

    kernel = functools.partial(_attn_slot_mask_kernel,
                               compute_dtype=compute_dtype,
                               exact_recip=exact_recip)

    ctx = pl.pallas_call(
        kernel,
        out_shape=jax.ShapeDtypeStruct((B, Q, Hp), hidden.dtype),
        grid_spec=pltpu.PrefetchScalarGridSpec(
            num_scalar_prefetch=0,
            grid=(B // bb, n_q),
            in_specs=[
                pl.BlockSpec((bb, tq, Hp), lambda b, q: (b, q, 0)),  # hidden
                pl.BlockSpec((bb, L, Hp), lambda b, q: (b, 0, 0)),   # outputs
                pl.BlockSpec((bb, tq, L), lambda b, q: (b, q, 0)),   # mask int8
            ],
            out_specs=pl.BlockSpec((bb, tq, Hp), lambda b, q: (b, q, 0)),
            scratch_shapes=scratch_shapes,
        ),
        compiler_params=pltpu.CompilerParams(**cp_kwargs),
    )(h_in, o_in, mask_i8)
    return ctx[..., :H] if Hp != H else ctx


# ----------------------------------------------------------------------------
# Pure-JAX reference (mirrors the PyTorch module).
# ----------------------------------------------------------------------------
def attn_slot_ref(hidden, outputs, mask):
    scores = jnp.einsum("bqh,blh->bql", hidden, outputs)
    scores = jnp.where(mask, MASK_FILL, scores)
    alpha = jax.nn.softmax(scores, axis=-1)
    return jnp.einsum("bql,blh->bqh", alpha, outputs)


if __name__ == "__main__":
    B, Q, L, H = 2, 16, 16, 32
    key = jax.random.PRNGKey(0)
    k1, k2 = jax.random.split(key, 2)

    hidden = jax.random.normal(k1, (B, Q, H), dtype=jnp.float32)
    outputs = jax.random.normal(k2, (B, L, H), dtype=jnp.float32)

    # Padding mask: positions >= length are masked (True = ignore).
    lengths = jnp.array([L, L // 2], dtype=jnp.int32)
    mask = jnp.broadcast_to(
        jnp.arange(L)[None, None, :] >= lengths[:, None, None], (B, Q, L))

    ref = attn_slot_ref(hidden, outputs, mask)

    # Fast path, default bf16 MXU matmuls (f32 accumulation / softmax stats).
    ctx = attn_slot_from_lengths(hidden, outputs, lengths)
    jax.block_until_ready(ctx)
    assert ctx.shape == (B, Q, H)
    assert jnp.allclose(ctx, ref, atol=1e-1, rtol=1e-1)

    # Fast path, exact f32 matmuls + exact divide (bit-closer PyTorch parity).
    ctx_f32 = attn_slot_from_lengths(hidden, outputs, lengths,
                                     compute_dtype=jnp.float32)
    jax.block_until_ready(ctx_f32)
    assert jnp.allclose(ctx_f32, ref, atol=1e-4, rtol=1e-4)

    # General boolean-mask path (exact PyTorch signature), int8 mask + bf16.
    ctx_m = attn_slot(hidden, outputs, mask)
    jax.block_until_ready(ctx_m)
    assert jnp.allclose(ctx_m, ref, atol=1e-1, rtol=1e-1)

    # Q-tiled path exercising the cached bf16 outputs-cast VMEM scratch.
    ctx_t = attn_slot_from_lengths(hidden, outputs, lengths, max_q_tile=8)
    jax.block_until_ready(ctx_t)
    assert jnp.allclose(ctx_t, ref, atol=1e-1, rtol=1e-1)

    print("KERNEL_OK")
</pallas_src>

<mosaic_0001>
module attributes {stable_mosaic.version = 11 : i64} {
  func.func @_attn_slot_lengths_kernel(%arg0: i32, %arg1: i32, %arg2: memref<2x1xi32, #tpu.memory_space<vmem>>, %arg3: memref<1x16x128xf32, #tpu.memory_space<vmem>>, %arg4: memref<1x16x128xf32, #tpu.memory_space<vmem>>, %arg5: memref<1x16x128xf32, #tpu.memory_space<vmem>>) attributes {dimension_semantics = [#tpu.dimension_semantics<parallel>, #tpu.dimension_semantics<arbitrary>], iteration_bounds = array<i64: 2, 1>, scalar_prefetch = 0 : i64, scratch_operands = 0 : i64, tpu.core_type = #tpu.core_type<tc>, window_params = [{pipeline_mode = #tpu.pipeline_mode<synchronous>, transform_indices = @transform_0, window_bounds = array<i64: 2, 1>}, {transform_indices = @transform_1, window_bounds = array<i64: 1, 16, 128>}, {transform_indices = @transform_2, window_bounds = array<i64: 1, 16, 128>}, {transform_indices = @transform_3, window_bounds = array<i64: 1, 16, 128>}]} {
    %c0 = arith.constant 0 : index
    %c0_0 = arith.constant 0 : index
    %c0_1 = arith.constant 0 : index
    %0 = vector.load %arg4[%c0, %c0_0, %c0_1] : memref<1x16x128xf32, #tpu.memory_space<vmem>>, vector<1x16x128xf32>
    %1 = arith.truncf %0 : vector<1x16x128xf32> to vector<1x16x128xbf16>
    %c1_i32 = arith.constant 1 : i32
    %2 = arith.muli %arg0, %c1_i32 : i32
    %3 = tpu.assume_multiple %2, 1 : i32
    %4 = arith.index_cast %3 : i32 to index
    %c0_2 = arith.constant 0 : index
    %5 = vector.load %arg2[%4, %c0_2] : memref<2x1xi32, #tpu.memory_space<vmem>>, vector<1x1xi32>
    %c0_3 = arith.constant 0 : index
    %c0_4 = arith.constant 0 : index
    %c0_5 = arith.constant 0 : index
    %6 = vector.load %arg3[%c0_3, %c0_4, %c0_5] : memref<1x16x128xf32, #tpu.memory_space<vmem>>, vector<1x16x128xf32>
    %7 = arith.truncf %6 : vector<1x16x128xf32> to vector<1x16x128xbf16>
    %cst = arith.constant dense<0.000000e+00> : vector<1x16x16xf32>
    %8 = tpu.matmul %7, %1, %cst {dimension_numbers = #tpu.dot_dimension_numbers<[2], [2], [1], [1], [0, 0, 0, 1, 1, 1], [0], [0]>} : vector<1x16x128xbf16>, vector<1x16x128xbf16>, vector<1x16x16xf32> -> vector<1x16x16xf32>
    %9 = tpu.iota {dimensions = array<i32: 2>} : vector<1x16x16xi32>
    %10 = vector.shape_cast %5 : vector<1x1xi32> to vector<1x1x1xi32>
    %11 = vector.broadcast %10 : vector<1x1x1xi32> to vector<1x16x16xi32>
    %12 = arith.cmpi sge, %9, %11 : vector<1x16x16xi32>
    %cst_6 = arith.constant -9.99999995E+11 : f32
    %13 = vector.broadcast %cst_6 : f32 to vector<1x16x16xf32>
    %14 = arith.select %12, %13, %8 : vector<1x16x16xi1>, vector<1x16x16xf32>
    %cst_7 = arith.constant dense<0xFF800000> : vector<1x16xf32>
    %15 = vector.multi_reduction <maximumf>, %14, %cst_7 [2] : vector<1x16x16xf32> to vector<1x16xf32>
    %16 = vector.shape_cast %15 : vector<1x16xf32> to vector<1x16x1xf32>
    %17 = vector.broadcast %16 : vector<1x16x1xf32> to vector<1x16x16xf32>
    %18 = arith.subf %14, %17 : vector<1x16x16xf32>
    %19 = math.exp %18 : vector<1x16x16xf32>
    %cst_8 = arith.constant dense<0.000000e+00> : vector<1x16xf32>
    %20 = vector.multi_reduction <add>, %19, %cst_8 [2] : vector<1x16x16xf32> to vector<1x16xf32>
    %21 = vector.shape_cast %20 : vector<1x16xf32> to vector<1x16x1xf32>
    %22 = arith.truncf %19 : vector<1x16x16xf32> to vector<1x16x16xbf16>
    %cst_9 = arith.constant dense<0.000000e+00> : vector<1x16x128xf32>
    %23 = tpu.matmul %22, %1, %cst_9 {dimension_numbers = #tpu.dot_dimension_numbers<[2], [1], [1], [2], [0, 0, 0, 1, 1, 2], [0], [0]>} : vector<1x16x16xbf16>, vector<1x16x128xbf16>, vector<1x16x128xf32> -> vector<1x16x128xf32>
    %24 = tpu.reciprocal %21 {approx = true} : vector<1x16x1xf32> -> vector<1x16x1xf32>
    %25 = vector.broadcast %24 : vector<1x16x1xf32> to vector<1x16x128xf32>
    %26 = arith.mulf %23, %25 : vector<1x16x128xf32>
    %c0_10 = arith.constant 0 : index
    %c0_11 = arith.constant 0 : index
    %c0_12 = arith.constant 0 : index
    %27 = vector.load %arg5[%c0_10, %c0_11, %c0_12] : memref<1x16x128xf32, #tpu.memory_space<vmem>>, vector<1x16x128xf32>
    tpu.vector_store %arg5[%c0_10, %c0_11, %c0_12], %26 {strides = array<i32>} : memref<1x16x128xf32, #tpu.memory_space<vmem>>, vector<1x16x128xf32>,
    return
  }
  func.func @transform_0(%arg0: i32, %arg1: i32) -> (i32, i32) {
    %c0_i32 = arith.constant 0 : i32
    %c0_i32_0 = arith.constant 0 : i32
    %c0_i32_1 = arith.constant 0 : i32
    return %c0_i32, %c0_i32_0 : i32, i32
  }
  func.func @transform_1(%arg0: i32, %arg1: i32) -> (i32, i32, i32) {
    %c0_i32 = arith.constant 0 : i32
    %c0_i32_0 = arith.constant 0 : i32
    return %arg0, %arg1, %c0_i32 : i32, i32, i32
  }
  func.func @transform_2(%arg0: i32, %arg1: i32) -> (i32, i32, i32) {
    %c0_i32 = arith.constant 0 : i32
    %c0_i32_0 = arith.constant 0 : i32
    %c0_i32_1 = arith.constant 0 : i32
    return %arg0, %c0_i32, %c0_i32_0 : i32, i32, i32
  }
  func.func @transform_3(%arg0: i32, %arg1: i32) -> (i32, i32, i32) {
    %c0_i32 = arith.constant 0 : i32
    %c0_i32_0 = arith.constant 0 : i32
    return %arg0, %arg1, %c0_i32 : i32, i32, i32
  }
}

</mosaic_0001>

<bundles_post_ra>
// kernel: tpu_custom_call.1
= control target key start
LH: loop header
LB: loop body
LE: loop exit
PB: predicated region body
PF: predicated region fallthrough
CT: control target
= control target key end

     0   :  { %8 = vsyncpa [#allocation3], 0  ;;  %s1052_s0 = inlined_call_operand.vmem [shape: s32[2,1], index: 0, kind: input, shape index: {}]   ;;  %s1053_s1 = inlined_call_operand.hbm [shape: f32[2,16,128], index: 1, kind: input, shape index: {}]   ;;  %s1054_s2 = inlined_call_operand.hbm [shape: f32[2,16,128], index: 2, kind: input, shape index: {}]   ;;  %s1055_s3 = inlined_call_operand.hbm [shape: f32[2,16,128], index: 3, kind: output, shape index: {}]  }
   0x1   :  { %10 = vsyncpa [#allocation3 + $0x1], 0 }
   0x2   :  { %11 = vsyncpa [#allocation6], 0 }
   0x3   :  { %13 = vsyncpa [#allocation6 + $0x1], 0 }
   0x4   :  { %14 = vsyncpa [#allocation4], 0 }
   0x5   :  { %16 = vsyncpa [#allocation4 + $0x1], 0  ;;  %s802_s12 = smov 0   ;;  %s804_s13 = smov 0  }
   0x6   :  { %s806_s14 = smov 0   ;;  %s808_s15 = smov 0  }
   0x7   :  { %s810_s16 = smov 0   ;;  %s812_s17 = smov 0  }
   0x8 LB: > { %s503_s18 = sadd.s32 4294967295, %s771_s17   ;;  %s504_s19 = sadd.s32 4294967294, %s771_s17   ;;  %s771_s17 = sphi %s812_s17, %s22_s17   ;;  %s767_s16 = sphi %s810_s16, %s1073_s16   ;;  %s763_s15 = sphi %s808_s15, %s1072_s15   ;;  %s759_s14 = sphi %s806_s14, %s1071_s14   ;;  %s755_s13 = sphi %s804_s13, %s1070_s13   ;;  %s751_s12 = sphi %s802_s12, %s1069_s12  }
   0x9   : > { %s34_s20 = sadd.s32 1, %s767_s16  ;;  %s64_s21 = sadd.s32 1, %s759_s14 }
   0xa   : > { %p36_p0 = scmp.ge.s32.totalorder %s34_s20, 2  ;;  %p71_p1 = scmp.ne.s32.totalorder %s759_s14, %s755_s13 }
   0xb   : > { %p72_p2 = scmp.eq.s32.totalorder %s771_s17, 0  ;;  %p77_p3 = scmp.ne.s32.totalorder %s755_s13, %s751_s12 }
   0xc   : > { %s1075_s20 = smov (%p36_p0, %s34_s20), 0  ;;  %p78_p5 = scmp.eq.s32.totalorder %s503_s18, 0 }
   0xd   : > { %p843_p4 = por %p72_p2, %p71_p1  ;;  %s59_s23 = ssub.s32 %s767_s16, %s1075_s20 }
   0xe   : > { %p129_p6 = scmp.eq.s32.totalorder %s503_s18, 1  ;;  %p62_p7 = scmp.eq.s32.totalorder %s59_s23, 0 }
   0xf   : > { %p849_p8 = por %p78_p5, %p77_p3  ;;  %p135_p10 = scmp.eq.s32.totalorder %s504_s19, 1 }
  0x10   : > { %p853_p9 = por %p129_p6, %p71_p1  ;;  %p561_p13 = scmp.lt.s32.totalorder %s771_s17, 2 }
  0x11   : > { %s1059_s24 = scalar_select %p849_p8, 1, 0 }
  0x12   : > { %s1060_s25 = scalar_select %p853_p9, 1, 0 }
  0x13   : > { %s858_s26 = scalar_select %p62_p7, %s759_s14, %s64_s21  }
  0x14   : > { %p860_p11 = por %p135_p10, %p77_p3  ;;  %s867_s28 = sand.u32 1, %s759_s14  }
  0x15   : > { %s507_s29 = sshll.u32 %s867_s28, 4  ;;  %s523_s30 = sshll.u32 %s767_s16, 8 }
  0x16   : > { %s1061_s27 = scalar_select %p860_p11, 1, 0 }
  0x17   : > { %s876_s6 = scalar_lea.hbm %s1053_s1, %s523_s30  ;;  %s162_s7 = scalar_lea.vmem [#allocation2], %s507_s29 }
  0x18   : > { %s171_s8 = sshll.u32 %s162_s7, 4  ;;  %p884_p0 = pnand %p561_p13, %p843_p4  ;;  %s880_s8 = int_to_ptr.vmem [resolvable:$true] %s171_s8 }
  0x19   : > { %s159_s10 = scalar_lea.sflag [#allocation3], %s867_s28  ;;  %s625_s11 = scalar_lea.hbm %s876_s6, 256 }
  0x1a   : > { %p626_p2 = scmp.ne.s32.totalorder %s876_s6, %s625_s11  ;;  %p627_p3 = pneg %p884_p0 }
  0x1b   : > { %s630_s21 = scalar_lea.hbm %s1053_s1, 512  ;;  %p631_p4 = scmp.lt.u32.totalorder %s876_s6, %s1053_s1 }
  0x1c   : > { %p628_p5 = pnand %p627_p3, %p626_p2  ;;  %p632_p7 = scmp.lt.u32.totalorder %s630_s21, %s625_s11 }
  0x1d   : > { %p634_p13 = scmp.lt.u32.totalorder %s625_s11, %s876_s6 }
  0x1e   : > { %p629_p6 = pneg %p628_p5  ;;  %p633_p10 = por %p632_p7, %p631_p4 }
  0x20   : > { %p635_p12 = por %p634_p13, %p633_p10 }
  0x22   : > { %p636_p1 = pnand %p635_p12, %p629_p6 }
  0x24   : > { %639 = shalt.err (!%p636_p1)
}
  0x25   : > { %s640_s4 = scalar_lea.vmem %s880_s8, 256  ;;  %s773_s5 = smov [#allocation2]  }
  0x26   : > { %p641_p2 = scmp.ne.s32.totalorder %s880_s8, %s640_s4  ;;  %s645_s7 = sshll.u32 %s773_s5, 4  ;;  %s646_s7 = int_to_ptr.vmem [resolvable:$false] %s645_s7 }
  0x27   : > { %s647_s18 = scalar_lea.vmem %s646_s7, 512  ;;  %p648_p9 = scmp.lt.s32.totalorder %s880_s8, %s646_s7 }
  0x28   : > { %p643_p5 = pnand %p641_p2, %p627_p3  ;;  %p649_p4 = scmp.lt.s32.totalorder %s647_s18, %s640_s4 }
  0x2a   : > { %p644_p11 = pneg %p643_p5  ;;  %p650_p7 = por %p649_p4, %p648_p9 }
  0x2c   : > { %p651_p10 = pnand %p650_p7, %p644_p11 }
  0x2e   : > { %654 = shalt.err (!%p651_p10)
}
  0x2f   : > { %s774_s11 = smov 128   ;;  %s775_s19 = smov 8  }
  0x30   : > { %553 = dma.hbm_to_vmem [thread:$0]  (!%p884_p0), %s876_s6, 256, %s880_s8, %s159_s10, %s774_s11, %s774_s11, %s775_s19  }
  0x31   : > { %p200_p9 = scmp.lt.s32.totalorder %s771_s17, 3  ;;  %s926_s23 = scalar_lea.hbm %s1054_s2, %s523_s30 }
  0x32   : > { %p1063_p11 = scmp.ge.s32.totalorder %s771_s17, 1  ;;  %s185_s5 = scalar_lea.vmem [#allocation5], %s507_s29 }
  0x33   : > { %s192_s7 = sshll.u32 %s185_s5, 4  ;;  %s182_s6 = scalar_lea.sflag [#allocation6], %s867_s28  ;;  %s936_s7 = int_to_ptr.vmem [resolvable:$true] %s192_s7 }
  0x34   : > { %p930_p12 = pnand %p1063_p11, %p200_p9  ;;  %s655_s8 = scalar_lea.hbm %s926_s23, 256 }
  0x35   : > { %p656_p1 = scmp.ne.s32.totalorder %s926_s23, %s655_s8  ;;  %s660_s18 = scalar_lea.hbm %s1054_s2, 512 }
  0x36   : > { %p661_p2 = scmp.lt.u32.totalorder %s926_s23, %s1054_s2  ;;  %p662_p5 = scmp.lt.u32.totalorder %s660_s18, %s655_s8 }
  0x37   : > { %p658_p6 = pnand %p656_p1, %p627_p3  ;;  %p664_p7 = scmp.lt.u32.totalorder %s655_s8, %s926_s23 }
  0x38   : > { %p663_p4 = por %p662_p5, %p661_p2 }
  0x39   : > { %p659_p13 = pneg %p658_p6 }
  0x3a   : > { %p665_p10 = por %p664_p7, %p663_p4 }
  0x3c   : > { %p666_p9 = pnand %p665_p10, %p659_p13 }
  0x3e   : > { %669 = shalt.err (!%p666_p9)
}
  0x3f   : > { %s670_s29 = scalar_lea.vmem %s936_s7, 256  ;;  %s776_s5 = smov [#allocation5]  }
  0x40   : > { %p671_p11 = scmp.ne.s32.totalorder %s936_s7, %s670_s29  ;;  %s675_s30 = sshll.u32 %s776_s5, 4  ;;  %s676_s30 = int_to_ptr.vmem [resolvable:$false] %s675_s30 }
  0x41   : > { %s677_s10 = scalar_lea.vmem %s676_s30, 512  ;;  %p678_p8 = scmp.lt.s32.totalorder %s936_s7, %s676_s30 }
  0x42   : > { %p673_p1 = pnand %p671_p11, %p627_p3  ;;  %p679_p2 = scmp.lt.s32.totalorder %s677_s10, %s670_s29 }
  0x44   : > { %p674_p6 = pneg %p673_p1  ;;  %p680_p5 = por %p679_p2, %p678_p8 }
  0x46   : > { %p681_p4 = pnand %p680_p5, %p674_p6 }
  0x48   : > { %684 = shalt.err (!%p681_p4)
}
  0x49   : > { %556 = dma.hbm_to_vmem [thread:$0]  (!%p884_p0), %s926_s23, 256, %s936_s7, %s182_s6, %s774_s11, %s774_s11, %s775_s19  }
  0x4a   : > { %204 = sbr.rel (%p930_p12) target bundleno = 702 (0x2be), region = 32  ;;  %s970_s8 = sand.u32 (!%p930_p12), 1, %s755_s13  }
  0x4b   : > { %s973_s18 = sshll.u32 (!%p930_p12), %s970_s8, 4  ;;  %s207_s9 = scalar_lea.sflag (!%p930_p12), [#allocation3], %s970_s8 }
  0x4c   : > { %s210_s21 = scalar_lea.vmem (!%p930_p12), [#allocation2], %s973_s18  ;;  %p1065_p8 = scmp.ne.s32.totalorder (!%p930_p12), %s1059_s24, 0 }
  0x51   : > { %738 = dma.done.wait (%p1065_p8), %s207_s9, 256  }
  0x52   : > { %740 = vsyncadd (%p1065_p8), %s207_s9, 4294967040  ;;  %s216_s28 = scalar_lea.sflag [#allocation6], %s970_s8  ;;  %s219_s11 = scalar_lea.vmem [#allocation5], %s973_s18 }
  0x53   : > { %742 = dma.done.wait (%p1065_p8), %s216_s28, 256  }
  0x54   : > { %744 = vsyncadd (%p1065_p8), %s216_s28, 4294967040  ;;  %v777_v0 = vmov 0.0   ;;  %vm778_vm0 = vmmov 0   ;;  %s253_s4 = scalar_lea.vmem %s1052_s0, %s763_s15  ;;  %v250_v1 = vld [vmem:[%s219_s11] sm:$0xff]  ;;  %v251_v2 = vld [vmem:[%s219_s11 + $0x8] sm:$0xff]  ;;  %v299_v8 = vlaneseq  ;;  %vm306_vm2 = vcmask 130048  }
  0x55   : > { %530 = vmatprep.subr.bf16.mxu0 %v777_v0  ;;  %532 = vmatprep.mubr.msk.bf16.mxu0 %vm778_vm0, %v777_v0  ;;  %v252_v3 = vpack.c.bf16 %v251_v2, %v250_v1  ;;  %v254_v4 = vld [vmem:[%s253_s4] sm:$0x1]  ;;  %v255_v5 = vld [vmem:[%s210_s21] sm:$0xff]  ;;  %s246_s7 = scalar_lea.vmem [#allocation7], %s973_s18  ;;  %s525_s22 = sshll.u32 %s763_s15, 8 }
  0x56   : > { %536 = vmatprep.subr.bf16.mxu1 %v777_v0  ;;  %538 = vmatprep.mubr.msk.bf16.mxu1 %vm778_vm0, %v777_v0  ;;  %542 = vpush %v254_v4  ;;  %v256_v6 = vld [vmem:[%s210_s21 + $0x8] sm:$0xff]  ;;  %v300_v9 = vand.u32 127, %v299_v8  ;;  %s392_s6 = sshll.u32 %s246_s7, 4  ;;  %s1003_s30 = scalar_lea.hbm %s1055_s3, %s525_s22  ;;  %s998_s6 = int_to_ptr.vmem [resolvable:$true] %s392_s6 }
  0x57   : > { %531 = vmatpush3.bf16.xpose.msra.mxu0 %v252_v3  ;;  %537 = vmatpush3.bf16.msra.mxu1 %v252_v3  ;;  %v257_v7 = vpack.c.bf16 %v256_v6, %v255_v5  ;;  %s377_s15 = scalar_lea.sflag [#allocation4], %s970_s8  ;;  %s685_s10 = scalar_lea.vmem %s998_s6, 256 }
  0x58   : > { %p686_p0 = scmp.ne.s32.totalorder %s998_s6, %s685_s10  ;;  %p1066_p3 = scmp.ne.s32.totalorder %s1060_s25, 0 }
  0x59   : > { %s779_s18 = smov [#allocation7]  }
  0x5a   : > { %p687_p12 = pnand %p686_p0, %p1066_p3  ;;  %s689_s9 = sshll.u32 %s779_s18, 4  ;;  %s690_s9 = int_to_ptr.vmem [resolvable:$false] %s689_s9 }
  0x5b   : > { %s691_s21 = scalar_lea.vmem %s690_s9, 512  ;;  %p692_p7 = scmp.lt.s32.totalorder %s998_s6, %s690_s9 }
  0x5c   : > { %p688_p13 = pneg %p687_p12  ;;  %p693_p10 = scmp.lt.s32.totalorder %s691_s21, %s685_s10 }
  0x5e   : > { %533 = vmatmul.mubr.bf16.vlgmr.msra.gmra.mrb[0].mxu0 %v257_v7  ;;  %p694_p9 = por %p693_p10, %p692_p7 }
  0x60   : > { %p695_p11 = pnand %p694_p9, %p688_p13 }
  0x87   : > { %s543_s24 = spop %542 }
  0x88   : > { %v302_v10 = vstv %s543_s24 }
  0x89   : > { %vm303_vm1 = vcmp.ge.s32.totalorder %v300_v9, %v302_v10 }
 0x131   : > { %v292_v11 = vpop.f32.mrb[0].mxu0 }
 0x132   : > { %v304_v12 = vsel %vm303_vm1, -1e+12, %v292_v11  ;;  %v534_v13 = vpop.f32.mrb[1].mxu0 }
 0x133   : > { %v295_v14 = vpop.f32.mrb[2].mxu0  ;;  %v307_v15 = vsel %vm306_vm2, %v304_v12, -inf }
 0x134   : > { %v305_v16 = vsel %vm303_vm1, -1e+12, %v295_v14  ;;  %308 = vmax.xlane.f32.xlu0 %v307_v15  ;;  %v535_v17 = vpop.f32.mrb[3].mxu0 }
 0x135   : > { %v310_v18 = vsel %vm306_vm2, %v305_v16, -inf }
 0x138   : > { %311 = vmax.xlane.f32.xlu0 %v310_v18 }
 0x1c1   : > { %v309_v19 = vpop.xlane.xlu0 %308 }
 0x1c2   : > { %v313_v20 = vsub.f32 %v304_v12, %v309_v19 }
 0x1c4   : > { %v315_v21 = vmul.f32 1.442695, %v313_v20 }
 0x1c5   : > { %v312_v22 = vpop.xlane.xlu0 %311 }
 0x1c6   : > { %617 = vpow2.f32 %v315_v21  ;;  %v314_v23 = vsub.f32 %v305_v16, %v312_v22 }
 0x1c8   : > { %v317_v24 = vmul.f32 1.442695, %v314_v23 }
 0x1ca   : > { %619 = vpow2.f32 %v317_v24 }
 0x1d0   : > { %v618_v25 = vpop.eup %617 }
 0x1d1   : > { %v319_v26 = vsel %vm306_vm2, %v618_v25, 0.0 }
 0x1d2   : > { %320 = vadd.xlane.f32.xlu1 %v319_v26 }
 0x1d4   : > { %v620_v27 = vpop.eup %619 }
 0x1d5   : > { %v322_v28 = vsel %vm306_vm2, %v620_v27, 0.0  ;;  %v325_v29 = vpack.c.bf16 %v620_v27, %v618_v25 }
 0x1d6   : > { %323 = vadd.xlane.f32.xlu1 %v322_v28 }
 0x1d7   : > { %539 = vmatmul.mubr.msk.bf16.vlgmr.msra.gmra.mrb[0].mxu1 %vm306_vm2, %v325_v29 }
 0x25f   : > { %v321_v30 = vpop.xlane.xlu1 %320 }
 0x260   : > { %621 = vrcp.f32 %v321_v30 }
 0x263   : > { %v324_v31 = vpop.xlane.xlu1 %323 }
 0x264   : > { %623 = vrcp.f32 %v324_v31 }
 0x26a   : > { %v622_v32 = vpop.eup %621 }
 0x26e   : > { %v624_v36 = vpop.eup %623 }
 0x2aa   : > { %v363_v33 = vpop.f32.mrb[0].mxu1 }
 0x2ab   : > { %v372_v34 = vmul.f32 %v622_v32, %v363_v33  ;;  %v540_v35 = vpop.f32.mrb[1].mxu1 }
 0x2ac   : > { %v366_v37 = vpop.f32.mrb[2].mxu1 }
 0x2ad   : > { %374 = vst [vmem:[%s246_s7] sm:$0xff] %v372_v34  ;;  %v373_v38 = vmul.f32 %v624_v36, %v366_v37  ;;  %v541_v39 = vpop.f32.mrb[3].mxu1 }
 0x2af   : > { %375 = vst [vmem:[%s246_s7 + $0x8] sm:$0xff] %v373_v38 }
 0x2b0   : > { %698 = shalt.err (!%p695_p11)
}
 0x2b1   : > { %s699_s28 = scalar_lea.hbm %s1003_s30, 256  ;;  %s703_s23 = scalar_lea.hbm %s1055_s3, 512 }
 0x2b2   : > { %p700_p1 = scmp.ne.s32.totalorder %s1003_s30, %s699_s28  ;;  %p704_p5 = scmp.lt.u32.totalorder %s1003_s30, %s1055_s3 }
 0x2b3   : > { %p705_p4 = scmp.lt.u32.totalorder %s703_s23, %s699_s28  ;;  %p707_p0 = scmp.lt.u32.totalorder %s699_s28, %s1003_s30 }
 0x2b4   : > { %p701_p6 = pnand %p700_p1, %p1066_p3 }
 0x2b5   : > { %p706_p8 = por %p705_p4, %p704_p5 }
 0x2b6   : > { %p702_p2 = pneg %p701_p6 }
 0x2b7   : > { %p708_p12 = por %p707_p0, %p706_p8 }
 0x2b9   : > { %p709_p13 = pnand %p708_p12, %p702_p2 }
 0x2bb   : > { %712 = shalt.err (!%p709_p13)
}
 0x2bc   : > { %s780_s7 = smov 128   ;;  %s781_s22 = smov 8  }
 0x2bd   : > { %548 = dma.vmem_to_hbm [thread:$0]  (%p1066_p3), %s998_s6, 256, %s1003_s30, %s377_s15, %s780_s7, %s780_s7, %s781_s22  }
 0x2be PF: > { %s407_s29 = sand.u32 1, %s751_s12   ;;  %p1067_p7 = scmp.ne.s32.totalorder %s1061_s27, 0 }
 0x2bf   : > { %p1068_p10 = scmp.ge.s32.totalorder %s771_s17, 2  ;;  %s408_s5 = scalar_lea.sflag [#allocation4], %s407_s29 }
 0x2c1   : > { %p558_p9 = pnand %p1068_p10, %p1067_p7 }
 0x2c3   : > { %746 = dma.done.wait (!%p558_p9), %s408_s5, 256  }
 0x2c4   : > { %748 = vsyncadd (!%p558_p9), %s408_s5, 4294967040  ;;  %s22_s17 = sadd.s32 1, %s771_s17   ;;  %s1069_s12 = smov %s755_s13 }
 0x2c5   : > { %p19_p11 = scmp.ge.s32.totalorder %s22_s17, 4   ;;  %s1070_s13 = smov %s759_s14 }
 0x2c6   : > { %s1071_s14 = smov %s858_s26  ;;  %s1072_s15 = smov %s767_s16 }
 0x2c7   : > { %s1073_s16 = smov %s1075_s20  ;;  %21 = sbr.rel (!%p19_p11) target bundleno = 8 (0x8), region = 91 }
 0x2ce   :  { %413 = vsyncpa [#allocation3], 1 }
 0x2cf   :  { %415 = vsyncpa [#allocation3 + $0x1], 1 }
 0x2d0   :  { %416 = vsyncpa [#allocation6], 1 }
 0x2d1   :  { %418 = vsyncpa [#allocation6 + $0x1], 1 }
 0x2d2   :  { %419 = vsyncpa [#allocation4], 1 }
 0x2d3   :  { %421 = vsyncpa [#allocation4 + $0x1], 1 }

</bundles_post_ra>
